<compile_context>
chip_gen: v6e
topology: v6e:2x2x1
jax: 0.10.0
libtpu: 0.0.40
codegen_flags: <defaults>
</compile_context>

<pallas_src>
import jax
import jax.numpy as jnp
import numpy as np
from jax.experimental import pallas as pl
from jax.experimental.pallas import tpu as pltpu


# ---------------------------------------------------------------------------
# Kernels
# ---------------------------------------------------------------------------
def _pos_kernel_flat(x_tile_ref, expand_ref, row_slab_ref, out_ref):
    """One grid step writes one lane-dense (2F, th*w) slab of the flat output.

    x_tile_ref:   (F, th*w)  grid-invariant replicated column embeddings
                             (precomputed in the wrapper, resident in VMEM)
    expand_ref:   (th, th*w) grid-invariant one-hot expansion E[t, l] = (l//w == t)
                             (precomputed in the wrapper, resident in VMEM)
    row_slab_ref: (1, F, th) per-tile row-embedding slab (F on sublanes)
    out_ref:      (2F, th*w) output block
    """
    f = x_tile_ref.shape[0]
    # y (row) half: expand (F, th) -> (F, th*w) with one tiny MXU matmul.
    y_part = jnp.dot(row_slab_ref[0], expand_ref[...],
                     preferred_element_type=jnp.float32).astype(out_ref.dtype)
    if f % 8 == 0:
        # Sublane-aligned halves -> two disjoint, unmasked slice stores.
        out_ref[:f, :] = x_tile_ref[...]
        out_ref[f:, :] = y_part
    else:
        # Avoid read-modify-write straddling a packed sublane tile.
        out_ref[...] = jnp.concatenate([x_tile_ref[...], y_part], axis=0)


def _pos_kernel_nchw(col_ref, row_slab_ref, out_ref):
    """Fallback: one grid step writes a (2F, th, w) NCHW block with pure
    broadcasts (masked lane stores when w < 128, but always legal and
    VMEM-bounded).

    col_ref:      (F, w)     column embeddings, F on sublanes (resident)
    row_slab_ref: (1, F, th) per-tile row-embedding slab
    out_ref:      (2F, th, w)
    """
    f2, th, w = out_ref.shape
    f = f2 // 2
    # Channels are the majormost axis of the 3D block, so the split stores do
    # not straddle sublane packing regardless of F.
    out_ref[:f] = jnp.broadcast_to(col_ref[...][:, None, :], (f, th, w))
    out_ref[f:] = jnp.broadcast_to(row_slab_ref[0][:, :, None], (f, th, w))


# ---------------------------------------------------------------------------
# Tile planning (true per-step VMEM footprint, not just the output block)
# ---------------------------------------------------------------------------
def _flat_footprint(th, w, f, itemsize):
    L = th * w
    return (2 * (2 * f) * L * itemsize     # output block x 2 pipeline buffers
            + 2 * f * L * itemsize         # resident replicated col (x) tile
            + 2 * th * L * itemsize        # resident one-hot expansion matrix
            + f * L * 4                    # f32 matmul result before store
            + 2 * f * th * itemsize)       # per-tile row slab (double-buffered)


def _nchw_footprint(th, w, f, itemsize):
    blk = th * w
    return (2 * (2 * f) * blk * itemsize   # output block x 2 pipeline buffers
            + 2 * f * blk * itemsize       # broadcast temporaries
            + 2 * f * w * itemsize         # resident col slab
            + 2 * f * th * itemsize)       # per-tile row slab


def _prefer_tiles():
    """>= 2 grid steps on v7x so the parallel axis spans both TensorCores;
    v5e / v6e have a single TC and prefer the single biggest tile."""
    try:
        kind = jax.devices()[0].device_kind.lower()
    except Exception:
        return 1
    return 2 if ("v7" in kind or "7x" in kind) else 1


def _plan_tiles(h, w, f, itemsize, budget_bytes, prefer_tiles):
    """Pick (mode, th) with th | h.

    mode "flat": lane-dense (2F, th*w) blocks, th*w % 128 == 0 (preferred).
    mode "nchw": (2F, th, w) blocks (masked lane stores when w < 128);
                 budget-respecting fallback.
    """
    divisors = [d for d in range(h, 0, -1) if h % d == 0]

    dense = [d for d in divisors
             if (d * w) % 128 == 0
             and _flat_footprint(d, w, f, itemsize) <= budget_bytes]
    if prefer_tiles > 1:
        multi = [d for d in dense if h // d >= prefer_tiles]
        if multi:
            return "flat", multi[0]
    if dense:
        return "flat", dense[0]

    # Legal NCHW blocks: second-minor th divisible by 8 or equal to h.
    legal = [d for d in divisors if d % 8 == 0 or d == h]
    ok = [d for d in legal if _nchw_footprint(d, w, f, itemsize) <= budget_bytes]
    if prefer_tiles > 1:
        multi = [d for d in ok if h // d >= prefer_tiles]
        if multi:
            return "nchw", multi[0]
    if ok:
        return "nchw", ok[0]
    # Last resort: smallest legal block (bounded VMEM even if over budget).
    return "nchw", legal[-1]


# ---------------------------------------------------------------------------
# Wrapper
# ---------------------------------------------------------------------------
def learned_positional_encoding(mask, row_weight, col_weight, *,
                                vmem_budget_bytes=16 << 20):
    """mask: [bs, h, w] (values unused; only the shape matters — as in torch).

    Returns pos: [bs, 2*num_feats, h, w], matching the PyTorch module.
    """
    bs, h, w = mask.shape
    num_feats = row_weight.shape[1]
    assert col_weight.shape[1] == num_feats
    assert h <= row_weight.shape[0] and w <= col_weight.shape[0]
    f = num_feats
    f2 = 2 * f
    out_dtype = jnp.result_type(row_weight.dtype, col_weight.dtype)
    itemsize = jnp.dtype(out_dtype).itemsize

    mode, th = _plan_tiles(h, w, f, itemsize, vmem_budget_bytes, _prefer_tiles())
    n_tiles = h // th

    # Grid-invariant wrapper-side prep (tiny XLA ops on <=50 x F tables):
    # tables pre-transposed so F sits on sublanes, positions on lanes.
    col_t = col_weight[:w].astype(out_dtype).T                        # (F, w)
    row_slabs = (row_weight[:h].astype(out_dtype)
                 .reshape(n_tiles, th, f).transpose(0, 2, 1))         # (n_tiles, F, th)

    if mode == "flat":
        fp = _flat_footprint(th, w, f, itemsize)
    else:
        fp = _nchw_footprint(th, w, f, itemsize)
    cparams = pltpu.CompilerParams(
        dimension_semantics=("parallel",),
        vmem_limit_bytes=int(min(48 << 20, max(32 << 20, 2 * fp))),
    )

    if mode == "flat":
        L = th * w
        # x half of every tile is identical -> precompute once, feed resident.
        x_tile = jnp.tile(col_t, (1, th))                             # (F, L)
        # One-hot expansion matrix E[t, l] = (l // w == t), built ONCE here
        # (no per-step iota / mod / div / compare work in the kernel).
        lane_row = jnp.arange(L, dtype=jnp.int32) // w
        expand = (lane_row[None, :] ==
                  jnp.arange(th, dtype=jnp.int32)[:, None]).astype(out_dtype)

        out_flat = pl.pallas_call(
            _pos_kernel_flat,
            out_shape=jax.ShapeDtypeStruct((f2, h * w), out_dtype),
            grid_spec=pltpu.PrefetchScalarGridSpec(
                num_scalar_prefetch=0,
                grid=(n_tiles,),
                in_specs=[
                    pl.BlockSpec((f, L), lambda i: (0, 0)),          # resident
                    pl.BlockSpec((th, L), lambda i: (0, 0)),         # resident
                    pl.BlockSpec((1, f, th), lambda i: (i, 0, 0)),   # per-tile slab
                ],
                out_specs=pl.BlockSpec((f2, L), lambda i: (0, i)),
            ),
            compiler_params=cparams,
        )(x_tile, expand, row_slabs)
        pos = out_flat.reshape(f2, h, w)   # contiguous reshape: free layout plumbing
    else:
        pos = pl.pallas_call(
            _pos_kernel_nchw,
            out_shape=jax.ShapeDtypeStruct((f2, h, w), out_dtype),
            grid_spec=pltpu.PrefetchScalarGridSpec(
                num_scalar_prefetch=0,
                grid=(n_tiles,),
                in_specs=[
                    pl.BlockSpec((f, w), lambda i: (0, 0)),          # resident
                    pl.BlockSpec((1, f, th), lambda i: (i, 0, 0)),   # per-tile slab
                ],
                out_specs=pl.BlockSpec((f2, th, w), lambda i: (0, i, 0)),
            ),
            compiler_params=cparams,
        )(col_t, row_slabs)

    # Batch repeat is a pure broadcast (identical per batch element).  Kept as
    # jnp.broadcast_to so a consuming jit fuses it instead of writing bs
    # copies to HBM; the torch-matching [bs, 2F, h, w] shape is preserved.
    return jnp.broadcast_to(pos[None], (bs, f2, h, w))


# ---------------------------------------------------------------------------
# Self-test
# ---------------------------------------------------------------------------
if __name__ == "__main__":
    # Module hyperparameters (small, deterministic, in-script init).
    num_feats = 16
    row_num_embed = 50
    col_num_embed = 50

    key = jax.random.PRNGKey(0)
    k_row, k_col, k_mask = jax.random.split(key, 3)

    # init_cfg = Uniform init for Embedding layers -> uniform weights.
    row_weight = jax.random.uniform(k_row, (row_num_embed, num_feats), jnp.float32)
    col_weight = jax.random.uniform(k_col, (col_num_embed, num_feats), jnp.float32)

    def reference(mask):
        b, hh, ww = mask.shape
        x_embed = col_weight[:ww]                              # (w, F)
        y_embed = row_weight[:hh]                              # (h, F)
        r = jnp.concatenate(
            [jnp.broadcast_to(x_embed[None, :, :], (hh, ww, num_feats)),
             jnp.broadcast_to(y_embed[:, None, :], (hh, ww, num_feats))], axis=-1)
        return jnp.broadcast_to(jnp.transpose(r, (2, 0, 1))[None],
                                (b, 2 * num_feats, hh, ww))

    # 1) Primary lane-dense flat-store path: [bs, h, w] = [2, 8, 16].
    bs, h, w = 2, 8, 16
    mask = (jax.random.uniform(k_mask, (bs, h, w)) > 0.5).astype(jnp.uint8)
    pos = jax.block_until_ready(learned_positional_encoding(mask, row_weight, col_weight))
    assert pos.shape == (bs, 2 * num_feats, h, w), pos.shape
    assert np.allclose(np.asarray(pos), np.asarray(reference(mask)),
                       rtol=1e-5, atol=1e-6), "mismatch vs reference (flat path)"

    # 2) Budget-respecting fallback path (no lane-dense tiling exists): h=6, w=10.
    bs2, h2, w2 = 2, 6, 10
    mask2 = jnp.zeros((bs2, h2, w2), jnp.uint8)
    pos2 = jax.block_until_ready(learned_positional_encoding(mask2, row_weight, col_weight))
    assert pos2.shape == (bs2, 2 * num_feats, h2, w2), pos2.shape
    assert np.allclose(np.asarray(pos2), np.asarray(reference(mask2)),
                       rtol=1e-5, atol=1e-6), "mismatch vs reference (nchw path)"

    print("KERNEL_OK")
</pallas_src>

<mosaic_0001>
module attributes {stable_mosaic.version = 11 : i64} {
  func.func @_pos_kernel_flat(%arg0: i32, %arg1: memref<16x128xf32, #tpu.memory_space<vmem>>, %arg2: memref<8x128xf32, #tpu.memory_space<vmem>>, %arg3: memref<1x16x8xf32, #tpu.memory_space<vmem>>, %arg4: memref<32x128xf32, #tpu.memory_space<vmem>>) attributes {dimension_semantics = [#tpu.dimension_semantics<parallel>], iteration_bounds = array<i64: 1>, scalar_prefetch = 0 : i64, scratch_operands = 0 : i64, tpu.core_type = #tpu.core_type<tc>, window_params = [{pipeline_mode = #tpu.pipeline_mode<synchronous>, transform_indices = @transform_0, window_bounds = array<i64: 16, 128>}, {pipeline_mode = #tpu.pipeline_mode<synchronous>, transform_indices = @transform_1, window_bounds = array<i64: 8, 128>}, {transform_indices = @transform_2, window_bounds = array<i64: 1, 16, 8>}, {transform_indices = @transform_3, window_bounds = array<i64: 32, 128>}]} {
    %c0 = arith.constant 0 : index
    %c0_0 = arith.constant 0 : index
    %c0_1 = arith.constant 0 : index
    %0 = vector.load %arg3[%c0, %c0_0, %c0_1] : memref<1x16x8xf32, #tpu.memory_space<vmem>>, vector<1x16x8xf32>
    %1 = vector.shape_cast %0 : vector<1x16x8xf32> to vector<16x8xf32>
    %c0_2 = arith.constant 0 : index
    %c0_3 = arith.constant 0 : index
    %2 = vector.load %arg2[%c0_2, %c0_3] : memref<8x128xf32, #tpu.memory_space<vmem>>, vector<8x128xf32>
    %cst = arith.constant dense<0.000000e+00> : vector<16x128xf32>
    %3 = tpu.matmul %1, %2, %cst {dimension_numbers = #tpu.dot_dimension_numbers<[1], [0], [0], [1], [0, 0, 1, 1], [], []>} : vector<16x8xf32>, vector<8x128xf32>, vector<16x128xf32> -> vector<16x128xf32>
    %c0_4 = arith.constant 0 : index
    %c0_5 = arith.constant 0 : index
    %4 = vector.load %arg1[%c0_4, %c0_5] : memref<16x128xf32, #tpu.memory_space<vmem>>, vector<16x128xf32>
    %c0_6 = arith.constant 0 : index
    %c0_7 = arith.constant 0 : index
    %5 = vector.load %arg4[%c0_6, %c0_7] : memref<32x128xf32, #tpu.memory_space<vmem>>, vector<16x128xf32>
    tpu.vector_store %arg4[%c0_6, %c0_7], %4 {strides = array<i32>} : memref<32x128xf32, #tpu.memory_space<vmem>>, vector<16x128xf32>,
    %c16 = arith.constant 16 : index
    %c0_8 = arith.constant 0 : index
    %6 = vector.load %arg4[%c16, %c0_8] : memref<32x128xf32, #tpu.memory_space<vmem>>, vector<16x128xf32>
    tpu.vector_store %arg4[%c16, %c0_8], %3 {strides = array<i32>} : memref<32x128xf32, #tpu.memory_space<vmem>>, vector<16x128xf32>,
    return
  }
  func.func @transform_0(%arg0: i32) -> (i32, i32) {
    %c0_i32 = arith.constant 0 : i32
    %c0_i32_0 = arith.constant 0 : i32
    %c0_i32_1 = arith.constant 0 : i32
    return %c0_i32, %c0_i32_0 : i32, i32
  }
  func.func @transform_1(%arg0: i32) -> (i32, i32) {
    %c0_i32 = arith.constant 0 : i32
    %c0_i32_0 = arith.constant 0 : i32
    %c0_i32_1 = arith.constant 0 : i32
    return %c0_i32, %c0_i32_0 : i32, i32
  }
  func.func @transform_2(%arg0: i32) -> (i32, i32, i32) {
    %c0_i32 = arith.constant 0 : i32
    %c0_i32_0 = arith.constant 0 : i32
    %c0_i32_1 = arith.constant 0 : i32
    return %arg0, %c0_i32, %c0_i32_0 : i32, i32, i32
  }
  func.func @transform_3(%arg0: i32) -> (i32, i32) {
    %c0_i32 = arith.constant 0 : i32
    %c0_i32_0 = arith.constant 0 : i32
    return %c0_i32, %arg0 : i32, i32
  }
}

</mosaic_0001>

<bundles_post_ra>
// kernel: tpu_custom_call.1
= control target key start
LH: loop header
LB: loop body
LE: loop exit
PB: predicated region body
PF: predicated region fallthrough
CT: control target
= control target key end

     0   :  { %vm18_vm0 = vcmask 64512   ;;  %s198_s0 = inlined_call_operand.vmem [shape: f32[16,128], index: 0, kind: input, shape index: {}]   ;;  %s199_s1 = inlined_call_operand.vmem [shape: f32[8,128], index: 1, kind: input, shape index: {}]   ;;  %s200_s2 = inlined_call_operand.vmem [shape: f32[1,16,8], index: 2, kind: input, shape index: {}]   ;;  %s201_s3 = inlined_call_operand.hbm [shape: f32[32,128], index: 3, kind: output, shape index: {}]  }
   0x1   :  { %v17_v0 = vld [vmem:[%s199_s1] sm:$0xff]  ;;  %v16_v2 = vld [vmem:[%s200_s2 + $0x8] sm:$0xff] }
   0x2   :  { %v15_v1 = vld [vmem:[%s200_s2] sm:$0xff]  ;;  %127 = vmatprep.subr.mxu0 %v17_v0 }
   0x3   :  { %129 = vmatprep.mubr.msk.f32.mxu0 %vm18_vm0, %v15_v1 }
   0x4   :  { %8 = vsyncpa [#allocation3], 0  ;;  %128 = vmatpush3.msra.mxu0 %v17_v0  ;;  %v100_v3 = vld [vmem:[%s198_s0] sm:$0xff]  ;;  %v101_v4 = vld [vmem:[%s198_s0 + $0x8] sm:$0xff]  ;;  %s157_s21 = smov [#allocation2]  }
   0x5   :  { %130 = vmatmul.mubr.msk.f32.vlgmr.msra.gmra.mxu0 %vm18_vm0, %v16_v2  ;;  %102 = vst [vmem:[#allocation2] sm:$0xff] %v100_v3  ;;  %103 = vst [vmem:[#allocation2 + $0x8] sm:$0xff] %v101_v4  ;;  %s111_s22 = sshll.u32 %s157_s21, 4  ;;  %s112_s22 = int_to_ptr.vmem [resolvable:$true] %s111_s22 }
   0x6   :  { %s135_s2 = scalar_lea.vmem %s112_s22, 512  ;;  %p140_p1 = scmp.lt.s32.totalorder %s112_s22, %s112_s22 }
   0x7   :  { %p136_p0 = scmp.ne.s32.totalorder %s112_s22, %s135_s2  ;;  %p141_p2 = scmp.lt.s32.totalorder %s135_s2, %s135_s2 }
   0x9   :  { %p142_p3 = por %p141_p2, %p140_p1 }
   0xb   :  { %p143_p4 = pnand %p142_p3, %p136_p0 }
  0xc5   :  { %v131_v5 = vpop.f32.mrf.mxu0 }
  0xc6   :  { %105 = vst [vmem:[#allocation2 + $0x18] sm:$0xff] %v131_v5 }
  0xc7   :  { %v91_v6 = vpop.f32.mrf.mxu0 }
  0xc8   :  { %104 = vst [vmem:[#allocation2 + $0x10] sm:$0xff] %v91_v6 }
  0xc9   :  { %146 = shalt.err (!%p143_p4)
}
  0xca   :  { %s158_s23 = smov 128   ;;  %s159_s24 = smov 8  }
  0xcb   :  { %117 = dma.vmem_to_hbm [thread:$0]  %s112_s22, 512, %s201_s3, [#allocation3], %s158_s23, %s158_s23, %s159_s24  }
  0xcc   :  { %155 = dma.done.wait [#allocation3], 512  }
  0xcd   :  { %156 = vsyncadd [#allocation3], 4294966784 }
  0xce   :  { %121 = vsyncpa [#allocation3], 1 }

</bundles_post_ra>
